<compile_context>
chip_gen: v7x
topology: tpu7x:2x2x1
jax: 0.10.0
libtpu: 0.0.40
codegen_flags: <defaults>
</compile_context>

<pallas_src>
import jax
import jax.numpy as jnp
from jax.experimental import pallas as pl
from jax.experimental.pallas import tpu as pltpu


def ce_argmax_kernel(logits_ref, targets_ref, nll_ref, pred_ref):
    """One (TILE_N, C) batch tile: per-row NLL + per-row argmax.

    logits_ref : (TILE_N, C) native dtype (f32/bf16) in VMEM
    targets_ref: (TILE_N, 1) int32 in VMEM
    nll_ref    : (TILE_N, 1) f32 output  (per-row -log p[target])
    pred_ref   : (TILE_N, 1) int32 output (per-row argmax over classes)
    """
    logits = logits_ref[...].astype(jnp.float32)            # (T, C)
    tn, num_classes = logits.shape

    # stable log-sum-exp (no log_probs materialization)
    row_max = jnp.max(logits, axis=-1, keepdims=True)        # (T, 1)
    sum_exp = jnp.sum(jnp.exp(logits - row_max), axis=-1, keepdims=True)
    lse = row_max + jnp.log(sum_exp)                          # (T, 1)

    # gather target logit via one-hot select (no dynamic gather)
    tgt = targets_ref[...]                                    # (T, 1) int32
    col_ids = jax.lax.broadcasted_iota(jnp.int32, (tn, num_classes), 1)
    onehot = col_ids == tgt                                   # (T, C) bool
    target_logit = jnp.sum(jnp.where(onehot, logits, 0.0),
                           axis=-1, keepdims=True)            # (T, 1)

    nll_ref[...] = lse - target_logit                         # (T, 1)

    # argmax fused with row_max: first index attaining the max
    # (matches torch first-index tie-break).
    pred = jnp.min(jnp.where(logits == row_max, col_ids, num_classes),
                   axis=-1, keepdims=True)                    # (T, 1)
    pred_ref[...] = pred.astype(jnp.int32)


def _choose_tile_n(n, c, itemsize, per_buffer_budget=4 * 1024 * 1024):
    """Largest multiple-of-8 row tile whose logits buffer fits ~4 MiB
    (safe for v7x's 64 MiB VMEM with double buffering, also fine on v5e/v6e)."""
    rows = max(8, (per_buffer_budget // max(1, c * itemsize)) // 8 * 8)
    tile = min(512, rows)
    tile = min(tile, max(8, pl.cdiv(n, 8) * 8))   # never exceed (padded) batch
    return int(tile)


def cross_entropy_and_pred(logits, targets, tile_n=None):
    """logits (N, C) f32/bf16, targets (N,) int -> (scalar mean CE loss, preds (N,))."""
    n, c = logits.shape
    itemsize = jnp.dtype(logits.dtype).itemsize

    if tile_n is None:
        tile_n = _choose_tile_n(n, c, itemsize)
    assert tile_n >= 8 and tile_n % 8 == 0, "tile_n must be a multiple of 8"

    n_pad = int(pl.cdiv(n, tile_n)) * tile_n
    num_tiles = n_pad // tile_n

    targets32 = targets.astype(jnp.int32)
    if n_pad != n:
        logits = jnp.pad(logits, ((0, n_pad - n), (0, 0)))
        targets32 = jnp.pad(targets32, ((0, n_pad - n),))
    targets_2d = targets32.reshape(n_pad, 1)

    cost = pl.CostEstimate(
        flops=5 * n_pad * c,                  # max, sub, cmp, select, sum passes
        transcendentals=n_pad * c,            # exp
        bytes_accessed=n_pad * c * itemsize + n_pad * 4 + n_pad * 8,
    )

    nll, pred = pl.pallas_call(
        ce_argmax_kernel,
        out_shape=(
            jax.ShapeDtypeStruct((n_pad, 1), jnp.float32),
            jax.ShapeDtypeStruct((n_pad, 1), jnp.int32),
        ),
        grid=(num_tiles,),
        in_specs=[
            pl.BlockSpec((tile_n, c), lambda i: (i, 0)),   # native dtype, no pre-cast
            pl.BlockSpec((tile_n, 1), lambda i: (i, 0)),
        ],
        out_specs=(
            pl.BlockSpec((tile_n, 1), lambda i: (i, 0)),
            pl.BlockSpec((tile_n, 1), lambda i: (i, 0)),
        ),
        compiler_params=pltpu.CompilerParams(
            dimension_semantics=("parallel",),             # independent batch tiles
            vmem_limit_bytes=32 * 1024 * 1024,
        ),
        cost_estimate=cost,
    )(logits, targets_2d)

    # tiny epilogue in XLA: drop padded rows, mean reduction (CrossEntropyLoss default)
    loss = jnp.sum(nll[:n, 0]) / n
    preds = pred[:n, 0]
    return loss, preds


if __name__ == "__main__":
    key = jax.random.PRNGKey(0)
    k1, k2, k3, k4 = jax.random.split(key, 4)

    # --- Test 1: toy shapes implied by the training loop (batch=8, classes=16), f32 ---
    N, C = 8, 16
    logits = jax.random.normal(k1, (N, C), dtype=jnp.float32)
    targets = jax.random.randint(k2, (N,), 0, C, dtype=jnp.int32)

    loss, preds = cross_entropy_and_pred(logits, targets)
    jax.block_until_ready((loss, preds))

    ref_logp = jax.nn.log_softmax(logits, axis=-1)
    ref_loss = -jnp.mean(ref_logp[jnp.arange(N), targets])
    ref_pred = jnp.argmax(logits, axis=-1).astype(jnp.int32)
    assert jnp.allclose(loss, ref_loss, atol=1e-5, rtol=1e-5), (loss, ref_loss)
    assert jnp.array_equal(preds, ref_pred)

    # --- Test 2: multi-tile + padded-batch path, bf16 inputs (native-dtype DMA) ---
    N2, C2 = 300, 137
    logits2 = jax.random.normal(k3, (N2, C2), dtype=jnp.float32).astype(jnp.bfloat16)
    targets2 = jax.random.randint(k4, (N2,), 0, C2, dtype=jnp.int32)

    loss2, preds2 = cross_entropy_and_pred(logits2, targets2, tile_n=128)
    jax.block_until_ready((loss2, preds2))

    l2 = logits2.astype(jnp.float32)
    ref_logp2 = jax.nn.log_softmax(l2, axis=-1)
    ref_loss2 = -jnp.mean(ref_logp2[jnp.arange(N2), targets2])
    ref_pred2 = jnp.argmax(l2, axis=-1).astype(jnp.int32)
    assert jnp.allclose(loss2, ref_loss2, atol=1e-4, rtol=1e-4), (loss2, ref_loss2)
    assert jnp.array_equal(preds2, ref_pred2)

    print("KERNEL_OK")
</pallas_src>

<mosaic_0001>
module attributes {stable_mosaic.version = 11 : i64} {
  func.func @ce_argmax_kernel(%arg0: i32, %arg1: memref<8x16xf32, #tpu.memory_space<vmem>>, %arg2: memref<8x1xi32, #tpu.memory_space<vmem>>, %arg3: memref<8x1xf32, #tpu.memory_space<vmem>>, %arg4: memref<8x1xi32, #tpu.memory_space<vmem>>) attributes {dimension_semantics = [#tpu.dimension_semantics<parallel>], iteration_bounds = array<i64: 1>, scalar_prefetch = 0 : i64, scratch_operands = 0 : i64, tpu.core_type = #tpu.core_type<tc>, window_params = [{transform_indices = @transform_0, window_bounds = array<i64: 8, 16>}, {transform_indices = @transform_1, window_bounds = array<i64: 8, 1>}, {transform_indices = @transform_2, window_bounds = array<i64: 8, 1>}, {transform_indices = @transform_3, window_bounds = array<i64: 8, 1>}]} {
    %c0 = arith.constant 0 : index
    %c0_0 = arith.constant 0 : index
    %0 = vector.load %arg1[%c0, %c0_0] : memref<8x16xf32, #tpu.memory_space<vmem>>, vector<8x16xf32>
    %cst = arith.constant dense<0xFF800000> : vector<8xf32>
    %1 = vector.multi_reduction <maximumf>, %0, %cst [1] : vector<8x16xf32> to vector<8xf32>
    %2 = vector.shape_cast %1 : vector<8xf32> to vector<8x1xf32>
    %3 = vector.broadcast %2 : vector<8x1xf32> to vector<8x16xf32>
    %4 = arith.subf %0, %3 : vector<8x16xf32>
    %5 = math.exp %4 : vector<8x16xf32>
    %cst_1 = arith.constant dense<0.000000e+00> : vector<8xf32>
    %6 = vector.multi_reduction <add>, %5, %cst_1 [1] : vector<8x16xf32> to vector<8xf32>
    %7 = vector.shape_cast %6 : vector<8xf32> to vector<8x1xf32>
    %8 = math.log %7 : vector<8x1xf32>
    %9 = arith.addf %2, %8 : vector<8x1xf32>
    %c0_2 = arith.constant 0 : index
    %c0_3 = arith.constant 0 : index
    %10 = vector.load %arg2[%c0_2, %c0_3] : memref<8x1xi32, #tpu.memory_space<vmem>>, vector<8x1xi32>
    %11 = tpu.iota {dimensions = array<i32: 1>} : vector<8x16xi32>
    %12 = vector.broadcast %10 : vector<8x1xi32> to vector<8x16xi32>
    %13 = arith.cmpi eq, %11, %12 : vector<8x16xi32>
    %cst_4 = arith.constant 0.000000e+00 : f32
    %14 = vector.broadcast %cst_4 : f32 to vector<8x16xf32>
    %15 = arith.select %13, %0, %14 : vector<8x16xi1>, vector<8x16xf32>
    %cst_5 = arith.constant dense<0.000000e+00> : vector<8xf32>
    %16 = vector.multi_reduction <add>, %15, %cst_5 [1] : vector<8x16xf32> to vector<8xf32>
    %17 = vector.shape_cast %16 : vector<8xf32> to vector<8x1xf32>
    %18 = arith.subf %9, %17 : vector<8x1xf32>
    %c0_6 = arith.constant 0 : index
    %c0_7 = arith.constant 0 : index
    %19 = vector.load %arg3[%c0_6, %c0_7] : memref<8x1xf32, #tpu.memory_space<vmem>>, vector<8x1xf32>
    tpu.vector_store %arg3[%c0_6, %c0_7], %18 {strides = array<i32>} : memref<8x1xf32, #tpu.memory_space<vmem>>, vector<8x1xf32>,
    %20 = vector.broadcast %2 : vector<8x1xf32> to vector<8x16xf32>
    %21 = arith.cmpf oeq, %0, %20 : vector<8x16xf32>
    %c16_i32 = arith.constant 16 : i32
    %22 = vector.broadcast %c16_i32 : i32 to vector<8x16xi32>
    %23 = arith.select %21, %11, %22 : vector<8x16xi1>, vector<8x16xi32>
    %cst_8 = arith.constant dense<2147483647> : vector<8xi32>
    %24 = vector.multi_reduction <minsi>, %23, %cst_8 [1] : vector<8x16xi32> to vector<8xi32>
    %25 = vector.shape_cast %24 : vector<8xi32> to vector<8x1xi32>
    %c0_9 = arith.constant 0 : index
    %c0_10 = arith.constant 0 : index
    %26 = vector.load %arg4[%c0_9, %c0_10] : memref<8x1xi32, #tpu.memory_space<vmem>>, vector<8x1xi32>
    tpu.vector_store %arg4[%c0_9, %c0_10], %25 {strides = array<i32>} : memref<8x1xi32, #tpu.memory_space<vmem>>, vector<8x1xi32>,
    return
  }
  func.func @transform_0(%arg0: i32) -> (i32, i32) {
    %c0_i32 = arith.constant 0 : i32
    %c0_i32_0 = arith.constant 0 : i32
    return %arg0, %c0_i32 : i32, i32
  }
  func.func @transform_1(%arg0: i32) -> (i32, i32) {
    %c0_i32 = arith.constant 0 : i32
    %c0_i32_0 = arith.constant 0 : i32
    return %arg0, %c0_i32 : i32, i32
  }
  func.func @transform_2(%arg0: i32) -> (i32, i32) {
    %c0_i32 = arith.constant 0 : i32
    %c0_i32_0 = arith.constant 0 : i32
    return %arg0, %c0_i32 : i32, i32
  }
  func.func @transform_3(%arg0: i32) -> (i32, i32) {
    %c0_i32 = arith.constant 0 : i32
    %c0_i32_0 = arith.constant 0 : i32
    return %arg0, %c0_i32 : i32, i32
  }
}

</mosaic_0001>

<bundles_post_ra>
// kernel: tpu_custom_call.1
= control target key start
LH: loop header
LB: loop body
LE: loop exit
PB: predicated region body
PF: predicated region fallthrough
CT: control target
= control target key end

     0   :  { %vm14_vm0 = vcmask 130048   ;;  %v74_v1 = vmov 0   ;;  %v28_v4 = vlaneseq  ;;  %vm39_vm4 = vcmask 7168   ;;  %s111_s0 = inlined_call_operand.vmem [shape: f32[8,16], index: 0, kind: input, shape index: {}]   ;;  %s112_s1 = inlined_call_operand.vmem [shape: s32[8,1], index: 1, kind: input, shape index: {}]   ;;  %s113_s3 = inlined_call_operand.vmem [shape: s32[8,1], index: 3, kind: output, shape index: {1}]   ;;  %s114_s2 = inlined_call_operand.vmem [shape: f32[8,1], index: 2, kind: output, shape index: {0}]  }
   0x1   :  { %v13_v0 = vld [vmem:[%s111_s0] sm:$0xff]  ;;  %68 = vset.pattern.permute.xlu1 %v74_v1  ;;  %69 = vset.pattern.permute.xlu0 %v74_v1 }
   0x2   :  { %v27_v2 = vld [vmem:[%s112_s1] sm:$0xff]  ;;  %v15_v3 = vsel %vm14_vm0, %v13_v0, -inf  ;;  %v29_v5 = vand.u32 127, %v28_v4 }
   0x3   :  { %31 = vperm.xlu1 %68, %v27_v2   ;;  %16 = vmax.xlane.f32.xlu0 %v15_v3 }
  0x82   :  { %v32_v15 = vpop.permute.xlu1 %31 }
  0x83   :  { %vm33_vm2 = vcmp.eq.s32.totalorder %v29_v5, %v32_v15 }
  0x84   :  { %v34_v19 = vsel %vm33_vm2, %v13_v0, 0.0 }
  0x85   :  { %v35_v21 = vsel %vm14_vm0, %v34_v19, 0.0 }
  0x90   :  { %v17_v6 = vpop.xlane.xlu0 %16 }
  0x91   :  { %v18_v7 = vsub.f32 %v13_v0, %v17_v6  ;;  %vm41_vm1 = vcmp.eq.f32.partialorder %v13_v0, %v17_v6 }
  0x92   :  { %v42_v8 = vsel %vm41_vm1, %v29_v5, 16 }
  0x93   :  { %v19_v9 = vmul.f32 1.442695, %v18_v7  ;;  %v43_v10 = vsel %vm14_vm0, %v42_v8, 2147483647 }
  0x94   :  { %v45_v11 = vshra.s32 %v43_v10, 16  ;;  %v44_v16 = vand.u32 65535, %v43_v10 }
  0x95   :  { %70 = vpow2.f32 %v19_v9 }
  0x96   :  { %v47_v12 = vcvt.s32.f32 %v45_v11  ;;  %v46_v18 = vcvt.s32.f32 %v44_v16 }
  0x98   :  { %48 = vmin.xlane.f32.xlu0 %v47_v12 }
  0x9f   :  { %v71_v13 = vpop.eup %70 }
  0xa0   :  { %v21_v14 = vsel %vm14_vm0, %v71_v13, 0.0 }
  0xa1   :  { %22 = vadd.xlane.f32.xlu1 %v21_v14 }
 0x125   :  { %v49_v17 = vpop.xlane.xlu0 %48 }
 0x126   :  { %vm50_vm3 = vcmp.eq.f32.partialorder %v47_v12, %v49_v17  ;;  %v55_v24 = vcvt.f32.s32 %v49_v17 }
 0x127   :  { %v51_v20 = vsel %vm50_vm3, %v46_v18, inf }
 0x128   :  { %52 = vmin.xlane.f32.xlu0 %v51_v20  ;;  %v56_v27 = vshll.u32 %v55_v24, 16 }
 0x12c   :  { %36 = vadd.xlane.f32.xlu0 %v35_v21 }
 0x12e   :  { %v23_v22 = vpop.xlane.xlu1 %22 }
 0x12f   :  { %72 = vlog2.f32 %v23_v22 }
 0x139   :  { %v73_v23 = vpop.eup %72 }
 0x13a   :  { %v25_v25 = vmul.f32 0.6931472, %v73_v23 }
 0x13c   :  { %v26_v30 = vadd.f32 %v25_v25, %v17_v6 }
 0x1b5   :  { %v53_v26 = vpop.xlane.xlu0 %52 }
 0x1b6   :  { %v54_v28 = vcvt.f32.s32 %v53_v26 }
 0x1b8   :  { %v57_v29 = vadd.s32 %v56_v27, %v54_v28 }
 0x1b9   :  { %v37_v31 = vpop.xlane.xlu0 %36 }
 0x1ba   :  { %58 = vst.msk [vmem:[%s113_s3] sm:$0xff] %vm39_vm4, %v57_v29  ;;  %v38_v32 = vsub.f32 %v26_v30, %v37_v31 }
 0x1bc   :  { %40 = vst.msk [vmem:[%s114_s2] sm:$0xff] %vm39_vm4, %v38_v32 }

</bundles_post_ra>
